<compile_context>
chip_gen: v7x
topology: tpu7x:2x2x1
jax: 0.10.0
libtpu: 0.0.40
codegen_flags: <defaults>
</compile_context>

<pallas_src>
import functools

import jax
import jax.numpy as jnp
from jax import lax
from jax.experimental import pallas as pl
from jax.experimental.pallas import tpu as pltpu


_VMEM_LIMIT_BYTES = 40 * 1024 * 1024


def _round_up(x, m):
    return ((x + m - 1) // m) * m


# --------------------------- Pallas kernels ---------------------------------

def _matmul_bias_single_kernel(a_ref, b_ref, bias_ref, o_ref, *, apply_relu):
    """Single-K-block fast path: o = relu?(a @ b + bias); no accumulator scratch."""
    acc = jnp.dot(a_ref[...], b_ref[...], preferred_element_type=jnp.float32)
    acc = acc + bias_ref[...]
    if apply_relu:
        acc = jnp.maximum(acc, 0.0)
    o_ref[...] = acc.astype(o_ref.dtype)


def _matmul_bias_acc_kernel(a_ref, b_ref, bias_ref, o_ref, acc_ref, *, apply_relu):
    """K-tiled path: acc(tm,n) += a(tm,tk) @ b(tk,n); bias+relu+store in epilogue."""
    k = pl.program_id(1)

    @pl.when(k == 0)
    def _():
        acc_ref[...] = jnp.zeros_like(acc_ref)

    acc_ref[...] += jnp.dot(a_ref[...], b_ref[...],
                            preferred_element_type=jnp.float32)

    @pl.when(k == pl.num_programs(1) - 1)
    def _():
        acc = acc_ref[...] + bias_ref[...]
        if apply_relu:
            acc = jnp.maximum(acc, 0.0)
        o_ref[...] = acc.astype(o_ref.dtype)


def matmul_bias(a, b, bias, *, apply_relu=False, tm=512, max_tk=16384,
                out_dtype=jnp.float32):
    """relu?(a @ b + bias).

    a:(M,K); b:(K,n_out) (NOT lane-padded: the B block spans the full last dim so
    the HBM weight read stays at its true width); bias:(1,n_out) f32.
    Inputs are cast to bf16 for the MXU; accumulation is f32.
    """
    M, K = a.shape
    Kb, n_out = b.shape
    assert Kb == K and bias.shape == (1, n_out)
    assert max_tk % 128 == 0

    a = a.astype(jnp.bfloat16)
    b = b.astype(jnp.bfloat16)
    bias = bias.astype(jnp.float32)

    # --- M tiling: pad M up to a multiple of tm (no ragged tail is dropped). ---
    tm = min(tm, _round_up(M, 8))
    Mp = _round_up(M, tm)
    if Mp != M:
        a = jnp.pad(a, ((0, Mp - M), (0, 0)))

    if K <= max_tk:
        # Single K block: no f32 accumulator scratch, 1-D all-parallel grid.
        out = pl.pallas_call(
            functools.partial(_matmul_bias_single_kernel, apply_relu=apply_relu),
            out_shape=jax.ShapeDtypeStruct((Mp, n_out), out_dtype),
            grid=(Mp // tm,),
            in_specs=[
                pl.BlockSpec((tm, K), lambda i: (i, 0)),
                pl.BlockSpec((K, n_out), lambda i: (0, 0)),
                pl.BlockSpec((1, n_out), lambda i: (0, 0)),
            ],
            out_specs=pl.BlockSpec((tm, n_out), lambda i: (i, 0)),
            compiler_params=pltpu.CompilerParams(
                dimension_semantics=("parallel",),
                vmem_limit_bytes=_VMEM_LIMIT_BYTES),
        )(a, b, bias)
        return out[:M]

    # --- K-tiled path with a VMEM f32 accumulator. ---
    tk = max_tk                        # multiple of 128
    Kp = _round_up(K, tk)
    if Kp != K:
        a = jnp.pad(a, ((0, 0), (0, Kp - K)))
        b = jnp.pad(b, ((0, Kp - K), (0, 0)))
    nk = Kp // tk

    out = pl.pallas_call(
        functools.partial(_matmul_bias_acc_kernel, apply_relu=apply_relu),
        out_shape=jax.ShapeDtypeStruct((Mp, n_out), out_dtype),
        grid=(Mp // tm, nk),
        in_specs=[
            pl.BlockSpec((tm, tk), lambda i, k: (i, k)),     # A row/K tile
            pl.BlockSpec((tk, n_out), lambda i, k: (k, 0)),  # B K tile (full width)
            pl.BlockSpec((1, n_out), lambda i, k: (0, 0)),   # bias
        ],
        out_specs=pl.BlockSpec((tm, n_out), lambda i, k: (i, 0)),
        scratch_shapes=[pltpu.VMEM((tm, n_out), jnp.float32)],
        compiler_params=pltpu.CompilerParams(
            dimension_semantics=("parallel", "arbitrary"),
            vmem_limit_bytes=_VMEM_LIMIT_BYTES),
    )(a, b, bias)
    return out[:M]


def _maxpool_kernel(x_ref, o_ref):
    """x_ref: (1, TH, 2, WO, 2*C) view of the input; o_ref: (1, TH, WO, C)."""
    c = o_ref.shape[3]
    hmax = jnp.maximum(x_ref[0, :, 0], x_ref[0, :, 1])       # max over the H pair
    o_ref[0] = jnp.maximum(hmax[..., :c], hmax[..., c:])     # max over the W pair


def maxpool2x2(x_nhwc):
    """2x2 / stride-2 max pool on NHWC, tiled + pipelined, single HBM pass."""
    N, H, W, C = x_nhwc.shape
    # nn.MaxPool2d(2,2) on the module's 256x256 path always sees even H, W.
    assert H % 2 == 0 and W % 2 == 0, "maxpool2x2 expects even spatial dims"
    HO, WO = H // 2, W // 2
    # Pure (contiguous) reshape: (N,H,W,C) -> (N,HO, 2, WO, 2*C); the two pooled
    # taps along W land on adjacent lane halves, the two taps along H on a
    # leading axis -> no strided slicing needed inside the kernel.
    xr = x_nhwc.reshape(N, HO, 2, WO, 2 * C)

    # Output-row block size: aim for ~1.5 MiB input blocks (HBM-roofline-friendly),
    # divisor of HO.
    bytes_per_outrow = 2 * WO * 2 * C * x_nhwc.dtype.itemsize
    th = max(1, min(HO, (3 * 512 * 1024) // max(1, bytes_per_outrow)))
    while HO % th:
        th -= 1

    return pl.pallas_call(
        _maxpool_kernel,
        out_shape=jax.ShapeDtypeStruct((N, HO, WO, C), x_nhwc.dtype),
        grid=(N, HO // th),
        in_specs=[pl.BlockSpec((1, th, 2, WO, 2 * C),
                               lambda n, i: (n, i, 0, 0, 0))],
        out_specs=pl.BlockSpec((1, th, WO, C), lambda n, i: (n, i, 0, 0)),
        compiler_params=pltpu.CompilerParams(
            dimension_semantics=("parallel", "parallel"),
            vmem_limit_bytes=_VMEM_LIMIT_BYTES),
    )(xr)


# ------------------------------ glue -----------------------------------------

def im2col(x_nhwc, kh, kw, pad):
    """(N,H,W,C) -> (N*H*W, kh*kw*C) patch matrix (stride 1, 'same' padding)."""
    N, H, W, C = x_nhwc.shape
    xp = jnp.pad(x_nhwc, ((0, 0), (pad, pad), (pad, pad), (0, 0)))
    cols = []
    for dy in range(kh):
        for dx in range(kw):
            cols.append(xp[:, dy:dy + H, dx:dx + W, :])
    patches = jnp.stack(cols, axis=3)                 # (N,H,W,kh*kw,C)
    return patches.reshape(N * H * W, kh * kw * C)


def conv3x3_relu(x_nhwc, w_mat, bias):
    """3x3/stride-1/pad-1 conv + ReLU; matmul+bias+relu runs in Pallas (MXU)."""
    N, H, W, _ = x_nhwc.shape
    a = im2col(x_nhwc, 3, 3, 1)                       # (N*H*W, 9*Cin) bf16
    # K = 27/144 <= max_tk -> single-K fast path (no accumulator scratch).
    y = matmul_bias(a, w_mat, bias, apply_relu=True,
                    tm=8192, out_dtype=jnp.bfloat16)  # (N*H*W, Cout)
    return y.reshape(N, H, W, -1)


def image_classifier_forward(x_nchw, p):
    x = jnp.transpose(x_nchw, (0, 2, 3, 1)).astype(jnp.bfloat16)   # NCHW -> NHWC
    x = conv3x3_relu(x, p["w1"], p["b1"])                          # conv1 + relu
    x = maxpool2x2(x)                                              # pool 1
    x = conv3x3_relu(x, p["w2"], p["b2"])                          # conv2 + relu
    x = maxpool2x2(x)                                              # pool 2
    # Flatten in NHWC order; fc weights were pre-permuted (in prepare_params) to
    # match PyTorch's NCHW x.view(N, -1) ordering, so no activation transpose.
    a = x.reshape(x.shape[0], -1)
    # Un-padded (K, num_classes) weight; at the real size K=131072 -> nk=4 K tiles.
    return matmul_bias(a, p["wf"], p["bf"], apply_relu=False,
                       max_tk=32768, out_dtype=jnp.float32)


# ---------------------- parameters & one-time prep ---------------------------

def init_params(key, num_classes, hw):
    """Deterministic synthetic parameters in PyTorch layout (fc input size
    scaled to the chosen spatial size hw)."""
    k1, k2, k3, k4, k5, k6 = jax.random.split(key, 6)
    fc_in = 32 * (hw // 4) * (hw // 4)
    return {
        "conv1_w": 0.05 * jax.random.normal(k1, (16, 3, 3, 3), jnp.float32),
        "conv1_b": 0.05 * jax.random.normal(k2, (16,), jnp.float32),
        "conv2_w": 0.05 * jax.random.normal(k3, (32, 16, 3, 3), jnp.float32),
        "conv2_b": 0.05 * jax.random.normal(k4, (32,), jnp.float32),
        "fc_w": 0.05 * jax.random.normal(k5, (num_classes, fc_in), jnp.float32),
        "fc_b": 0.05 * jax.random.normal(k6, (num_classes,), jnp.float32),
    }


def prepare_params(params):
    """One-time (hoisted) weight prep: OIHW -> (9*Cin, Cout) matrices, bf16 cast,
    and the NCHW-flatten column permutation of fc_w.  No lane padding anywhere."""
    c1, c2 = params["conv1_w"], params["conv2_w"]
    cout1, cin1 = c1.shape[0], c1.shape[1]
    cout2, cin2 = c2.shape[0], c2.shape[1]
    w1 = jnp.transpose(c1, (2, 3, 1, 0)).reshape(9 * cin1, cout1)
    w2 = jnp.transpose(c2, (2, 3, 1, 0)).reshape(9 * cin2, cout2)

    fc_w = params["fc_w"]                               # (num_classes, C*H*W)
    num_classes, fc_in = fc_w.shape
    hw4 = int(round((fc_in // cout2) ** 0.5))
    wf = fc_w.T.reshape(cout2, hw4, hw4, num_classes)   # rows were (C,H,W)
    wf = jnp.transpose(wf, (1, 2, 0, 3)).reshape(fc_in, num_classes)  # -> (H,W,C)

    return {
        "w1": w1.astype(jnp.bfloat16),
        "b1": params["conv1_b"].reshape(1, -1).astype(jnp.float32),
        "w2": w2.astype(jnp.bfloat16),
        "b2": params["conv2_b"].reshape(1, -1).astype(jnp.float32),
        "wf": wf.astype(jnp.bfloat16),
        "bf": params["fc_b"].reshape(1, -1).astype(jnp.float32),
    }


# ------------------------- pure-JAX reference --------------------------------

def reference_forward(x_nchw, params):
    dn = ("NCHW", "OIHW", "NCHW")
    x = lax.conv_general_dilated(x_nchw, params["conv1_w"], (1, 1),
                                 [(1, 1), (1, 1)], dimension_numbers=dn)
    x = jnp.maximum(x + params["conv1_b"][None, :, None, None], 0.0)
    x = lax.reduce_window(x, -jnp.inf, lax.max, (1, 1, 2, 2), (1, 1, 2, 2), "VALID")
    x = lax.conv_general_dilated(x, params["conv2_w"], (1, 1),
                                 [(1, 1), (1, 1)], dimension_numbers=dn)
    x = jnp.maximum(x + params["conv2_b"][None, :, None, None], 0.0)
    x = lax.reduce_window(x, -jnp.inf, lax.max, (1, 1, 2, 2), (1, 1, 2, 2), "VALID")
    x = x.reshape(x.shape[0], -1)
    return x @ params["fc_w"].T + params["fc_b"]


# ------------------------------- main -----------------------------------------

if __name__ == "__main__":
    key = jax.random.PRNGKey(0)
    kx, kp, ka, kb, kc = jax.random.split(key, 5)

    # --- small-shape check of the K-tiled accumulator + ragged-M paths ----------
    # (at full 256x256 size the FC uses K=131072 > max_tk; force that code path
    #  here with a tiny max_tk and a non-multiple M so it is exercised on TPU).
    A = jax.random.normal(ka, (37, 1024), jnp.float32)
    B = jax.random.normal(kb, (1024, 10), jnp.float32)
    bias_t = jax.random.normal(kc, (1, 10), jnp.float32)
    got = matmul_bias(A, B, bias_t, apply_relu=False, tm=32, max_tk=256)
    want = jnp.dot(A.astype(jnp.bfloat16), B.astype(jnp.bfloat16),
                   preferred_element_type=jnp.float32) + bias_t
    got = jax.block_until_ready(got)
    assert got.shape == (37, 10)
    assert jnp.allclose(got, want, rtol=2e-2, atol=2e-2), "K-tiled matmul mismatch"

    # --- end-to-end forward at small shapes (module targets 256x256 at full size) --
    N, C, HW = 2, 3, 16
    num_classes = 10

    x = jax.random.normal(kx, (N, C, HW, HW), jnp.float32)
    raw_params = init_params(kp, num_classes, HW)
    params = prepare_params(raw_params)          # hoisted one-time weight prep

    logits = jax.jit(image_classifier_forward)(x, params)
    logits = jax.block_until_ready(logits)

    ref = reference_forward(x, raw_params)
    assert logits.shape == (N, num_classes)
    # bf16 MXU inputs / bf16 intermediate activations -> compare with a looser
    # tolerance than pure-f32 (f32 accumulation keeps the error well below this).
    max_err = float(jnp.max(jnp.abs(logits - ref)))
    assert jnp.allclose(logits, ref, rtol=5e-2, atol=5e-2), (
        f"mismatch vs reference (max abs err {max_err})")

    print("KERNEL_OK")
</pallas_src>

<mosaic_0001>
module attributes {stable_mosaic.version = 11 : i64} {
  func.func @_matmul_bias_acc_kernel(%arg0: i32, %arg1: i32, %arg2: memref<32x256xbf16, #tpu.memory_space<vmem>>, %arg3: memref<256x10xbf16, #tpu.memory_space<vmem>>, %arg4: memref<1x10xf32, #tpu.memory_space<vmem>>, %arg5: memref<32x10xf32, #tpu.memory_space<vmem>>, %arg6: memref<32x10xf32, #tpu.memory_space<vmem>>) attributes {dimension_semantics = [#tpu.dimension_semantics<parallel>, #tpu.dimension_semantics<arbitrary>], iteration_bounds = array<i64: 2, 4>, scalar_prefetch = 0 : i64, scratch_operands = 1 : i64, tpu.core_type = #tpu.core_type<tc>, window_params = [{transform_indices = @transform_0, window_bounds = array<i64: 32, 256>}, {transform_indices = @transform_1, window_bounds = array<i64: 256, 10>}, {pipeline_mode = #tpu.pipeline_mode<synchronous>, transform_indices = @transform_2, window_bounds = array<i64: 1, 10>}, {transform_indices = @transform_3, window_bounds = array<i64: 32, 10>}]} {
    %c0_i32 = arith.constant 0 : i32
    %0 = arith.cmpi eq, %arg1, %c0_i32 : i32
    %1 = arith.extui %0 : i1 to i32
    %c0_i32_0 = arith.constant 0 : i32
    %2 = arith.cmpi ne, %1, %c0_i32_0 : i32
    scf.if %2 {
      %cst_9 = arith.constant 0.000000e+00 : f32
      %12 = vector.broadcast %cst_9 : f32 to vector<32x10xf32>
      %c0_10 = arith.constant 0 : index
      %c0_11 = arith.constant 0 : index
      %13 = vector.load %arg6[%c0_10, %c0_11] : memref<32x10xf32, #tpu.memory_space<vmem>>, vector<32x10xf32>
      tpu.vector_store %arg6[%c0_10, %c0_11], %12 {strides = array<i32>} : memref<32x10xf32, #tpu.memory_space<vmem>>, vector<32x10xf32>,
    } else {
    }
    %c0 = arith.constant 0 : index
    %c0_1 = arith.constant 0 : index
    %3 = vector.load %arg6[%c0, %c0_1] : memref<32x10xf32, #tpu.memory_space<vmem>>, vector<32x10xf32>
    %c0_2 = arith.constant 0 : index
    %c0_3 = arith.constant 0 : index
    %4 = vector.load %arg2[%c0_2, %c0_3] : memref<32x256xbf16, #tpu.memory_space<vmem>>, vector<32x256xbf16>
    %c0_4 = arith.constant 0 : index
    %c0_5 = arith.constant 0 : index
    %5 = vector.load %arg3[%c0_4, %c0_5] : memref<256x10xbf16, #tpu.memory_space<vmem>>, vector<256x10xbf16>
    %cst = arith.constant dense<0.000000e+00> : vector<32x10xf32>
    %6 = tpu.matmul %4, %5, %cst {dimension_numbers = #tpu.dot_dimension_numbers<[1], [0], [0], [1], [0, 0, 1, 1], [], []>} : vector<32x256xbf16>, vector<256x10xbf16>, vector<32x10xf32> -> vector<32x10xf32>
    %7 = arith.addf %3, %6 : vector<32x10xf32>
    %c0_6 = arith.constant 0 : index
    %c0_7 = arith.constant 0 : index
    %8 = vector.load %arg6[%c0_6, %c0_7] : memref<32x10xf32, #tpu.memory_space<vmem>>, vector<32x10xf32>
    tpu.vector_store %arg6[%c0_6, %c0_7], %7 {strides = array<i32>} : memref<32x10xf32, #tpu.memory_space<vmem>>, vector<32x10xf32>,
    %c3_i32 = arith.constant 3 : i32
    %9 = arith.cmpi eq, %arg1, %c3_i32 : i32
    %10 = arith.extui %9 : i1 to i32
    %c0_i32_8 = arith.constant 0 : i32
    %11 = arith.cmpi ne, %10, %c0_i32_8 : i32
    scf.if %11 {
      %c0_9 = arith.constant 0 : index
      %c0_10 = arith.constant 0 : index
      %12 = vector.load %arg6[%c0_9, %c0_10] : memref<32x10xf32, #tpu.memory_space<vmem>>, vector<32x10xf32>
      %c0_11 = arith.constant 0 : index
      %c0_12 = arith.constant 0 : index
      %13 = vector.load %arg4[%c0_11, %c0_12] : memref<1x10xf32, #tpu.memory_space<vmem>>, vector<1x10xf32>
      %14 = vector.broadcast %13 : vector<1x10xf32> to vector<32x10xf32>
      %15 = arith.addf %12, %14 : vector<32x10xf32>
      %c0_13 = arith.constant 0 : index
      %c0_14 = arith.constant 0 : index
      %16 = vector.load %arg5[%c0_13, %c0_14] : memref<32x10xf32, #tpu.memory_space<vmem>>, vector<32x10xf32>
      tpu.vector_store %arg5[%c0_13, %c0_14], %15 {strides = array<i32>} : memref<32x10xf32, #tpu.memory_space<vmem>>, vector<32x10xf32>,
    } else {
    }
    return
  }
  func.func @transform_0(%arg0: i32, %arg1: i32) -> (i32, i32) {
    %c0_i32 = arith.constant 0 : i32
    return %arg0, %arg1 : i32, i32
  }
  func.func @transform_1(%arg0: i32, %arg1: i32) -> (i32, i32) {
    %c0_i32 = arith.constant 0 : i32
    %c0_i32_0 = arith.constant 0 : i32
    return %arg1, %c0_i32 : i32, i32
  }
  func.func @transform_2(%arg0: i32, %arg1: i32) -> (i32, i32) {
    %c0_i32 = arith.constant 0 : i32
    %c0_i32_0 = arith.constant 0 : i32
    %c0_i32_1 = arith.constant 0 : i32
    return %c0_i32, %c0_i32_0 : i32, i32
  }
  func.func @transform_3(%arg0: i32, %arg1: i32) -> (i32, i32) {
    %c0_i32 = arith.constant 0 : i32
    %c0_i32_0 = arith.constant 0 : i32
    return %arg0, %c0_i32 : i32, i32
  }
}

</mosaic_0001>

<bundles_post_ra>
// kernel: tpu_custom_call.1
= control target key start
LH: loop header
LB: loop body
LE: loop exit
PB: predicated region body
PF: predicated region fallthrough
CT: control target
= control target key end

     0   :  { %s837_s12 = smov 0   ;;  %s839_s13 = smov 0   ;;  %s972_s0 = inlined_call_operand.vmem [shape: bf16[64,1024], index: 0, kind: input, shape index: {}]   ;;  %s973_s1 = inlined_call_operand.vmem [shape: bf16[1024,10], index: 1, kind: input, shape index: {}]   ;;  %s974_s2 = inlined_call_operand.vmem [shape: f32[1,10], index: 2, kind: input, shape index: {}]   ;;  %s975_s3 = inlined_call_operand.vmem [shape: f32[64,10], index: 3, kind: output, shape index: {}]  }
   0x1   :  { %s841_s14 = smov 0   ;;  %s843_s15 = smov 0  }
   0x2   :  { %s845_s16 = smov 0   ;;  %s847_s17 = smov 0  }
   0x3   :  { %s849_s18 = smov 0  }
   0x4 LB: > { %s22_s19 = sadd.s32 1, %s806_s16  ;;  %s25_s20 = sadd.s32 1, %s810_s17  ;;  %s814_s18 = sphi %s849_s18, %s13_s18   ;;  %s810_s17 = sphi %s847_s17, %s981_s17   ;;  %s806_s16 = sphi %s845_s16, %s980_s16   ;;  %s802_s15 = sphi %s843_s15, %s979_s15   ;;  %s798_s14 = sphi %s841_s14, %s978_s14   ;;  %s794_s13 = sphi %s839_s13, %s977_s13   ;;  %s790_s12 = sphi %s837_s12, %s976_s12  }
   0x5   : > { %p23_p0 = scmp.ge.s32.totalorder %s22_s19, 4  ;;  %p41_p1 = scmp.ne.s32.totalorder %s794_s13, %s790_s12 }
   0x6   : > { %p42_p2 = scmp.eq.s32.totalorder %s814_s18, 0  ;;  %s34_s24 = sadd.s32 1, %s794_s13 }
   0x7   : > { %s983_s19 = smov (%p23_p0, %s22_s19), 0  ;;  %s985_s20 = smov (!%p23_p0, %s25_s20), %s810_s17 }
   0x8   : > { %p43_p3 = por %p42_p2, %p41_p1  ;;  %p27_p4 = scmp.ge.s32.totalorder %s985_s20, 2 }
   0x9   : > { %s30_s21 = ssub.s32 %s806_s16, %s983_s19  ;;  %p599_p6 = scmp.ge.s32.totalorder %s814_s18, 8 }
   0xa   : > { %s987_s20 = smov (%p27_p4, %s985_s20), 0 }
   0xb   : > { %s29_s22 = ssub.s32 %s810_s17, %s987_s20  ;;  %143 = sbr.rel (%p599_p6) target bundleno = 29 (0x1d), region = 20 }
   0xc   : > { %s31_s23 = sor.u32 %s30_s21, %s29_s22 }
   0xd   : > { %p32_p5 = scmp.eq.s32.totalorder %s31_s23, 0 }
   0xf   : > { %s888_s25 = scalar_select %p32_p5, %s794_s13, %s34_s24  }
  0x12   : > { %146 = sbr.rel (!%p43_p3) target bundleno = 29 (0x1d), region = 24  ;;  %s148_s26 = sand.u32 (%p43_p3), 1, %s794_s13  }
  0x13   : > { %s602_s27 = sshll.u32 (%p43_p3), %s806_s16, 1  ;;  %s600_s28 = sshll.u32 (%p43_p3), %s148_s26, 5 }
  0x14   : > { %s636_s29 = sshll.u32 (%p43_p3), %s810_s17, 5  ;;  %s150_s8 = scalar_lea.vmem (%p43_p3), [#allocation3], %s600_s28 }
  0x15   : > { %s154_s30 = sadd.s32 (%p43_p3), %s636_s29, %s602_s27 }
  0x16   : > { %s604_s4 = sshll.u32 (%p43_p3), %s154_s30, 2 }
  0x17   : > { %s156_s7 = scalar_lea.vmem (%p43_p3), %s972_s0, %s604_s4 }
  0x18   : > { %v190_v0 = vld [vmem:[%s156_s7] sm:$0xff] (%p43_p3) }
  0x19   : > { %v192_v1 = vld [vmem:[%s156_s7 + $0x20] sm:$0xff]  ;;  %191 = vst [vmem:[%s150_s8] sm:$0xff] %v190_v0 }
  0x1a   : > { %v194_v2 = vld [vmem:[%s156_s7 + $0x40] sm:$0xff]  ;;  %193 = vst [vmem:[%s150_s8 + $0x8] sm:$0xff] %v192_v1 }
  0x1b   : > { %195 = vst [vmem:[%s150_s8 + $0x10] sm:$0xff] %v194_v2  ;;  %v196_v3 = vld [vmem:[%s156_s7 + $0x60] sm:$0xff] }
  0x1c   : > { %197 = vst [vmem:[%s150_s8 + $0x18] sm:$0xff] %v196_v3 }
  0x1d PF: > { %p605_p7 = scmp.ge.s32.totalorder %s814_s18, 1  ;;  %p211_p8 = scmp.lt.s32.totalorder %s814_s18, 9 }
  0x1f   : > { %p212_p9 = pnand %p605_p7, %p211_p8 }
  0x20   : > { %s218_s9 = sand.u32 (!%p212_p9), 1, %s790_s12   ;;  %s607_s10 = sshll.u32 (!%p212_p9), %s798_s14, 5 }
  0x21   : > { %215 = sbr.rel (%p212_p9) target bundleno = 313 (0x139), region = 66  ;;  %s606_s11 = sshll.u32 (!%p212_p9), %s218_s9, 5 }
  0x22   : > { %p249_p10 = scmp.lt.s32.totalorder (!%p212_p9), %s607_s10, 127  ;;  %s609_s21 = sshll.u32 (!%p212_p9), %s802_s15, 2 }
  0x23   : > { %p255_p11 = scmp.lt.s32.totalorder (!%p212_p9), %s609_s21, 7  ;;  %s912_s12 = scalar_lea.vmem (!%p212_p9), [#allocation3], %s606_s11 }
  0x24   : > { %p611_p12 = scmp.ne.s32.totalorder (!%p212_p9), %s798_s14, 0 }
  0x28   : > { %s989_s10 = smov (!%p249_p10, %s607_s10), 127  ;;  %s991_s21 = smov (!%p255_p11, %s609_s21), 7 }
  0x29   : > { %s608_s22 = sshll.u32 %s989_s10, 2  ;;  %s610_s27 = sshll.u32 %s991_s21, 3  ;;  %vm265_vm0 = vcmask (!%p611_p12), 80896   ;;  %v816_v4 = vmov (!%p611_p12), 0.0  }
  0x2a   : > { %s905_s26 = scalar_lea.vmem %s973_s1, %s608_s22  ;;  %s910_s30 = scalar_lea.vmem %s975_s3, %s610_s27  ;;  %266 = vst.msk [vmem:[#allocation2] sm:$0xff] (!%p611_p12), %vm265_vm0, %v816_v4  ;;  %267 = vst.msk [vmem:[#allocation2 + $0x8] sm:$0xff] (!%p611_p12), %vm265_vm0, %v816_v4 }
  0x2b   : > { %264 = sbr.rel (%p611_p12) target bundleno = 50 (0x32), region = 74  ;;  %268 = vst.msk [vmem:[#allocation2 + $0x10] sm:$0xff] (!%p611_p12), %vm265_vm0, %v816_v4  ;;  %269 = vst.msk [vmem:[#allocation2 + $0x18] sm:$0xff] (!%p611_p12), %vm265_vm0, %v816_v4 }
  0x32 PF: > { %v738_v5 = vld [vmem:[%s905_s26 + $0x40] sm:$0xff]   ;;  %v740_v7 = vld [vmem:[%s905_s26 + $0x48] sm:$0xff]   ;;  %v742_v9 = vld [vmem:[%s905_s26 + $0x50] sm:$0xff]   ;;  %vm479_vm1 = vcmask 80896   ;;  %p632_p13 = scmp.ne.s32.totalorder %s798_s14, 3 }
  0x33   : > { %v739_v6 = vld [vmem:[%s905_s26] sm:$0xff]   ;;  %637 = vmatprep.subr.bf16.mxu0 %v738_v5  ;;  %665 = vmatprep.subr.bf16.mxu1 %v738_v5  ;;  %v741_v8 = vld [vmem:[%s905_s26 + $0x8] sm:$0xff]   ;;  %v743_v10 = vld [vmem:[%s905_s26 + $0x10] sm:$0xff]  }
  0x34   : > { %638 = vmatpush3.bf16.msra.mxu0 %v739_v6  ;;  %673 = vmatpush3.bf16.msra.mxu1 %v739_v6  ;;  %v744_v11 = vld [vmem:[%s905_s26 + $0x58] sm:$0xff]   ;;  %v746_v13 = vld [vmem:[%s905_s26 + $0x60] sm:$0xff]   ;;  %v748_v15 = vld [vmem:[%s905_s26 + $0x68] sm:$0xff]  }
  0x35   : > { %639 = vmatprep.subr.bf16.mxu0 %v740_v7  ;;  %666 = vmatprep.subr.bf16.mxu1 %v740_v7  ;;  %v745_v12 = vld [vmem:[%s905_s26 + $0x18] sm:$0xff]   ;;  %v747_v14 = vld [vmem:[%s905_s26 + $0x20] sm:$0xff]   ;;  %v749_v18 = vld [vmem:[%s905_s26 + $0x28] sm:$0xff]  }
  0x36   : > { %v756_v16 = vld [vmem:[%s912_s12 + $0x4] ss:$8 sps:$4 sm:$0xff]   ;;  %v759_v17 = vld [vmem:[%s912_s12 + $0x14] ss:$8 sps:$4 sm:$0xff]   ;;  %v754_v23 = vld [vmem:[%s912_s12] ss:$8 sps:$4 sm:$0xff]  }
  0x37   : > { %v750_v19 = vld [vmem:[%s905_s26 + $0x70] sm:$0xff]   ;;  %458 = vmatprep.mubr.bf16.mxu0 %v756_v16  ;;  %466 = vmatprep.mubr.bf16.mxu1 %v759_v17  ;;  %v752_v21 = vld [vmem:[%s905_s26 + $0x78] sm:$0xff]   ;;  %v270_v27 = vld [vmem:[#allocation2] sm:$0xff] }
  0x38   : > { %640 = vmatpush3.bf16.msra.mxu0 %v741_v8  ;;  %674 = vmatpush3.bf16.msra.mxu1 %v741_v8  ;;  %v751_v20 = vld [vmem:[%s905_s26 + $0x30] sm:$0xff]   ;;  %v753_v22 = vld [vmem:[%s905_s26 + $0x38] sm:$0xff]   ;;  %v271_v35 = vld [vmem:[#allocation2 + $0x8] sm:$0xff] }
  0x39   : > { %641 = vmatprep.subr.bf16.mxu0 %v742_v9  ;;  %667 = vmatprep.subr.bf16.mxu1 %v742_v9  ;;  %v757_v24 = vld [vmem:[%s912_s12 + $0x10] ss:$8 sps:$4 sm:$0xff]   ;;  %v633_v46 = vld [vmem:[%s974_s2] ss:$0 sm:$0xff] (!%p632_p13) }
  0x3a   : > { %v272_v29 = vld [vmem:[#allocation2 + $0x10] sm:$0xff]  ;;  %v273_v37 = vld [vmem:[#allocation2 + $0x18] sm:$0xff] }
  0x3c   : > { %642 = vmatpush3.bf16.msra.mxu0 %v743_v10  ;;  %675 = vmatpush3.bf16.msra.mxu1 %v743_v10 }
  0x3d   : > { %643 = vmatprep.subr.bf16.mxu0 %v744_v11  ;;  %668 = vmatprep.subr.bf16.mxu1 %v744_v11 }
  0x40   : > { %644 = vmatpush3.bf16.msra.mxu0 %v745_v12  ;;  %676 = vmatpush3.bf16.msra.mxu1 %v745_v12 }
  0x41   : > { %645 = vmatprep.subr.bf16.mxu0 %v746_v13  ;;  %669 = vmatprep.subr.bf16.mxu1 %v746_v13 }
  0x44   : > { %646 = vmatpush3.bf16.msra.mxu0 %v747_v14  ;;  %677 = vmatpush3.bf16.msra.mxu1 %v747_v14 }
  0x45   : > { %647 = vmatprep.subr.bf16.mxu0 %v748_v15  ;;  %670 = vmatprep.subr.bf16.mxu1 %v748_v15 }
  0x48   : > { %648 = vmatpush3.bf16.msra.mxu0 %v749_v18  ;;  %678 = vmatpush3.bf16.msra.mxu1 %v749_v18 }
  0x49   : > { %649 = vmatprep.subr.bf16.mxu0 %v750_v19  ;;  %671 = vmatprep.subr.bf16.mxu1 %v750_v19 }
  0x4c   : > { %650 = vmatpush3.bf16.msra.mxu0 %v751_v20  ;;  %679 = vmatpush3.bf16.msra.mxu1 %v751_v20 }
  0x4d   : > { %651 = vmatprep.subr.bf16.mxu0 %v752_v21  ;;  %672 = vmatprep.subr.bf16.mxu1 %v752_v21 }
  0x50   : > { %652 = vmatpush3.bf16.msra.mxu0 %v753_v22  ;;  %680 = vmatpush3.bf16.msra.mxu1 %v753_v22 }
  0x53   : > { %459 = vmatmul.mubr.bf16.vlgmr.msra.gmra.mrb[0].mxu0 %v754_v23  ;;  %467 = vmatmul.mubr.bf16.vlgmr.msra.gmra.mrb[0].mxu1 %v757_v24 }
 0x126   : > { %v653_v25 = vpop.f32.mrb[0].mxu0  ;;  %v659_v26 = vpop.f32.mrb[0].mxu1 }
 0x127   : > { %v654_v28 = vpop.f32.mrb[1].mxu0  ;;  %v660_v30 = vpop.f32.mrb[1].mxu1 }
 0x128   : > { %v655_v31 = vadd.f32 %v654_v28, %v653_v25  ;;  %v661_v32 = vadd.f32 %v660_v30, %v659_v26  ;;  %v656_v33 = vpop.f32.mrb[2].mxu0  ;;  %v662_v34 = vpop.f32.mrb[2].mxu1  ;;  %487 = sbr.rel (%p632_p13) target bundleno = 313 (0x139), region = 78 }
 0x129   : > { %v657_v36 = vpop.f32.mrb[3].mxu0  ;;  %v663_v38 = vpop.f32.mrb[3].mxu1 }
 0x12a   : > { %v475_v39 = vadd.f32 %v655_v31, %v270_v27  ;;  %v477_v40 = vadd.f32 %v661_v32, %v272_v29  ;;  %v658_v41 = vadd.f32 %v657_v36, %v656_v33  ;;  %v664_v42 = vadd.f32 %v663_v38, %v662_v34 }
 0x12c   : > { %480 = vst.msk [vmem:[#allocation2] sm:$0xff] %vm479_vm1, %v475_v39  ;;  %482 = vst.msk [vmem:[#allocation2 + $0x10] sm:$0xff] %vm479_vm1, %v477_v40  ;;  %v476_v43 = vadd.f32 %v658_v41, %v271_v35  ;;  %v478_v44 = vadd.f32 %v664_v42, %v273_v37 }
 0x12e   : > { %481 = vst.msk [vmem:[#allocation2 + $0x8] sm:$0xff] %vm479_vm1, %v476_v43  ;;  %483 = vst.msk [vmem:[#allocation2 + $0x18] sm:$0xff] %vm479_vm1, %v478_v44 }
 0x133   : > { %v488_v45 = vld [vmem:[#allocation2] sm:$0xff]  ;;  %v490_v50 = vld [vmem:[#allocation2 + $0x10] sm:$0xff] }
 0x134   : > { %v499_v48 = vadd.f32 %v633_v46, %v488_v45  ;;  %v501_v52 = vadd.f32 %v633_v46, %v490_v50 }
 0x135   : > { %v489_v47 = vld [vmem:[#allocation2 + $0x8] sm:$0xff]  ;;  %v491_v51 = vld [vmem:[#allocation2 + $0x18] sm:$0xff] }
 0x136   : > { %v500_v49 = vadd.f32 %v633_v46, %v489_v47  ;;  %v502_v53 = vadd.f32 %v633_v46, %v491_v51  ;;  %503 = vst.msk [vmem:[%s910_s30] sm:$0xff] %vm479_vm1, %v499_v48  ;;  %505 = vst.msk [vmem:[%s910_s30 + $0x10] sm:$0xff] %vm479_vm1, %v501_v52 }
 0x138   : > { %504 = vst.msk [vmem:[%s910_s30 + $0x8] sm:$0xff] %vm479_vm1, %v500_v49  ;;  %506 = vst.msk [vmem:[%s910_s30 + $0x18] sm:$0xff] %vm479_vm1, %v502_v53 }
 0x139 PF: > { %s13_s18 = sadd.s32 1, %s814_s18   ;;  %s976_s12 = smov %s794_s13 }
 0x13a   : > { %p10_p0 = scmp.ge.s32.totalorder %s13_s18, 10   ;;  %s977_s13 = smov %s888_s25 }
 0x13b   : > { %s978_s14 = smov %s806_s16  ;;  %s979_s15 = smov %s810_s17 }
 0x13c   : > { %s980_s16 = smov %s983_s19  ;;  %s981_s17 = smov %s987_s20 }
 0x13d   :  { %12 = sbr.rel (!%p10_p0) target bundleno = 4 (0x4), region = 116 }

</bundles_post_ra>
